<compile_context>
chip_gen: v5e
topology: v5e:2x2
jax: 0.10.0
libtpu: 0.0.40
codegen_flags: <defaults>
</compile_context>

<pallas_src>
import math

import jax
import jax.numpy as jnp
from jax import lax
from jax.experimental import pallas as pl
from jax.experimental.pallas import tpu as pltpu

VOCAB_SIZE = 128
TILE_ROWS = 8192  # 8192 x 128 x f32 = 4 MiB/tile; 8 MiB double-buffered.


def _mix(x):
    """32-bit integer mixer (splitmix-style finalizer). x: uint32 array."""
    x = x ^ (x >> 16)
    x = x * jnp.uint32(0x7FEB352D)
    x = x ^ (x >> 15)
    x = x * jnp.uint32(0x846CA68B)
    x = x ^ (x >> 16)
    return x


def _bits_to_unit_float(bits):
    """Map uint32 random bits to float32 in [1, 2) via exponent bitcast."""
    mant = bits >> 9  # keep 23 mantissa bits
    return lax.bitcast_convert_type(jnp.uint32(0x3F800000) | mant, jnp.float32)


def _make_randn_kernel(use_hw_prng: bool):
    def kernel(seed_ref, o_ref):
        rows, vocab = o_ref.shape          # (tile_rows, 128), both static
        h = (rows + 1) // 2                # sublane split: pair rows, not lanes

        if use_hw_prng:
            # Distinct stream per grid step; HW PRNG keeps the VALU free.
            pltpu.prng_seed(seed_ref[0], pl.program_id(0))
            b1 = pltpu.bitcast(pltpu.prng_random_bits((h, vocab)), jnp.uint32)
            b2 = pltpu.bitcast(pltpu.prng_random_bits((h, vocab)), jnp.uint32)
        else:
            # Portable stateless counter-hash fallback (non-TPU backends).
            i = pl.program_id(0)
            row = lax.broadcasted_iota(jnp.uint32, (h, vocab), 0)
            lane = lax.broadcasted_iota(jnp.uint32, (h, vocab), 1)
            grow = (i * rows).astype(jnp.uint32) + row
            counter = (grow << jnp.uint32(7)) + lane          # vocab == 128
            key = _mix(seed_ref[0].astype(jnp.uint32) ^ jnp.uint32(0xA511E9B3))
            b1 = _mix(counter ^ key)
            b2 = _mix((counter ^ key) + jnp.uint32(0x9E3779B9))

        # u1 in (0, 1] (safe for log), u2 in [0, 1).
        u1 = jnp.float32(2.0) - _bits_to_unit_float(b1)
        u2 = _bits_to_unit_float(b2) - jnp.float32(1.0)

        # Box-Muller; both outputs used, written as two dense 128-lane row slabs.
        r = jnp.sqrt(jnp.float32(-2.0) * jnp.log(u1))
        theta = jnp.float32(2.0 * math.pi) * u2
        o_ref[:h, :] = r * jnp.cos(theta)
        if rows - h > 0:
            o_ref[h:, :] = (r * jnp.sin(theta))[: rows - h, :]

    return kernel


def _choose_tile_rows(total_rows: int) -> int:
    """Pick a tile that divides total_rows, is a multiple of 8, fits VMEM, and
    yields >=2 grid steps when possible (so v7x's 2 TensorCores both work)."""
    tile = total_rows  # whole-array single block: always legal fallback
    if total_rows % 16 == 0:
        target = min(TILE_ROWS, total_rows // 2)
        t = (target // 8) * 8
        while t >= 8 and total_rows % t != 0:
            t -= 8
        if t >= 8:
            tile = t
    elif total_rows > TILE_ROWS and total_rows % 8 == 0:
        t = (TILE_ROWS // 8) * 8
        while t >= 8 and total_rows % t != 0:
            t -= 8
        if t >= 8:
            tile = t
    return tile


def dummy_model_forward(x, seed: int = 0):
    """Equivalent of DummyModel.forward: returns randn(batch, seq, VOCAB_SIZE)."""
    batch_size, seq_len = x.shape
    total_rows = batch_size * seq_len
    total_elems = total_rows * VOCAB_SIZE

    tile_rows = _choose_tile_rows(total_rows)
    grid = (pl.cdiv(total_rows, tile_rows),)

    use_hw_prng = jax.default_backend() == "tpu"
    seed_arr = jnp.array([seed], dtype=jnp.int32)

    flat = pl.pallas_call(
        _make_randn_kernel(use_hw_prng),
        out_shape=jax.ShapeDtypeStruct((total_rows, VOCAB_SIZE), jnp.float32),
        grid=grid,
        in_specs=[pl.BlockSpec(memory_space=pltpu.MemorySpace.SMEM)],
        out_specs=pl.BlockSpec((tile_rows, VOCAB_SIZE), lambda i: (i, 0)),
        compiler_params=pltpu.CompilerParams(
            dimension_semantics=("parallel",)),
        cost_estimate=pl.CostEstimate(
            flops=10 * total_elems,
            transcendentals=2 * total_elems,
            bytes_accessed=4 * total_elems),
    )(seed_arr)

    return flat.reshape(batch_size, seq_len, VOCAB_SIZE)


if __name__ == "__main__":
    key = jax.random.PRNGKey(0)
    batch_size, seq_len = 2, 8
    # Token-id style input (only its shape matters, as in the PyTorch module).
    x = jax.random.randint(key, (batch_size, seq_len), 0, VOCAB_SIZE,
                           dtype=jnp.int32)

    out = dummy_model_forward(x, seed=0)
    out = jax.block_until_ready(out)

    assert out.shape == (batch_size, seq_len, VOCAB_SIZE), out.shape
    assert out.dtype == jnp.float32, out.dtype
    assert bool(jnp.all(jnp.isfinite(out))), "non-finite values in output"
    # Loose distribution sanity check (N(0,1) over 2048 samples).
    assert abs(float(out.mean())) < 0.2 and 0.7 < float(out.std()) < 1.3

    print("KERNEL_OK")
</pallas_src>

<mosaic_0001>
module attributes {stable_mosaic.version = 11 : i64} {
  func.func @kernel(%arg0: i32, %arg1: memref<1xi32, #tpu.memory_space<smem>>, %arg2: memref<8x128xf32, #tpu.memory_space<vmem>>) attributes {dimension_semantics = [#tpu.dimension_semantics<parallel>], iteration_bounds = array<i64: 2>, scalar_prefetch = 0 : i64, scratch_operands = 0 : i64, tpu.core_type = #tpu.core_type<tc>, window_params = [{transform_indices = @transform_0, window_bounds = array<i64: 1>}, {transform_indices = @transform_1, window_bounds = array<i64: 8, 128>}]} {
    %0 = tpu.iota {dimensions = array<i32: 0>} : vector<4x128xi32>
    %1 = tpu.iota {dimensions = array<i32: 1>} : vector<4x128xi32>
    %c8_i32 = arith.constant 8 : i32
    %2 = arith.muli %arg0, %c8_i32 : i32
    %3 = vector.broadcast %2 : i32 to vector<4x128xi32>
    %4 = arith.addi %3, %0 : vector<4x128xi32>
    %c7_i32 = arith.constant 7 : i32
    %5 = vector.broadcast %c7_i32 : i32 to vector<4x128xi32>
    %6 = arith.shli %4, %5 : vector<4x128xi32>
    %7 = arith.addi %6, %1 : vector<4x128xi32>
    %c0 = arith.constant 0 : index
    %8 = memref.load %arg1[%c0] : memref<1xi32, #tpu.memory_space<smem>>
    %c-1525552717_i32 = arith.constant -1525552717 : i32
    %9 = arith.xori %8, %c-1525552717_i32 : i32
    %c16_i32 = arith.constant 16 : i32
    %10 = arith.shrui %9, %c16_i32 : i32
    %11 = arith.xori %9, %10 : i32
    %c2146121005_i32 = arith.constant 2146121005 : i32
    %12 = arith.muli %11, %c2146121005_i32 : i32
    %c15_i32 = arith.constant 15 : i32
    %13 = arith.shrui %12, %c15_i32 : i32
    %14 = arith.xori %12, %13 : i32
    %c-2073254261_i32 = arith.constant -2073254261 : i32
    %15 = arith.muli %14, %c-2073254261_i32 : i32
    %c16_i32_0 = arith.constant 16 : i32
    %16 = arith.shrui %15, %c16_i32_0 : i32
    %17 = arith.xori %15, %16 : i32
    %18 = vector.broadcast %17 : i32 to vector<4x128xi32>
    %19 = arith.xori %7, %18 : vector<4x128xi32>
    %c16_i32_1 = arith.constant 16 : i32
    %20 = vector.broadcast %c16_i32_1 : i32 to vector<4x128xi32>
    %21 = arith.shrui %19, %20 : vector<4x128xi32>
    %22 = arith.xori %19, %21 : vector<4x128xi32>
    %c2146121005_i32_2 = arith.constant 2146121005 : i32
    %23 = vector.broadcast %c2146121005_i32_2 : i32 to vector<4x128xi32>
    %24 = arith.muli %22, %23 : vector<4x128xi32>
    %c15_i32_3 = arith.constant 15 : i32
    %25 = vector.broadcast %c15_i32_3 : i32 to vector<4x128xi32>
    %26 = arith.shrui %24, %25 : vector<4x128xi32>
    %27 = arith.xori %24, %26 : vector<4x128xi32>
    %c-2073254261_i32_4 = arith.constant -2073254261 : i32
    %28 = vector.broadcast %c-2073254261_i32_4 : i32 to vector<4x128xi32>
    %29 = arith.muli %27, %28 : vector<4x128xi32>
    %c16_i32_5 = arith.constant 16 : i32
    %30 = vector.broadcast %c16_i32_5 : i32 to vector<4x128xi32>
    %31 = arith.shrui %29, %30 : vector<4x128xi32>
    %32 = arith.xori %29, %31 : vector<4x128xi32>
    %33 = vector.broadcast %17 : i32 to vector<4x128xi32>
    %34 = arith.xori %7, %33 : vector<4x128xi32>
    %c-1640531527_i32 = arith.constant -1640531527 : i32
    %35 = vector.broadcast %c-1640531527_i32 : i32 to vector<4x128xi32>
    %36 = arith.addi %34, %35 : vector<4x128xi32>
    %c16_i32_6 = arith.constant 16 : i32
    %37 = vector.broadcast %c16_i32_6 : i32 to vector<4x128xi32>
    %38 = arith.shrui %36, %37 : vector<4x128xi32>
    %39 = arith.xori %36, %38 : vector<4x128xi32>
    %c2146121005_i32_7 = arith.constant 2146121005 : i32
    %40 = vector.broadcast %c2146121005_i32_7 : i32 to vector<4x128xi32>
    %41 = arith.muli %39, %40 : vector<4x128xi32>
    %c15_i32_8 = arith.constant 15 : i32
    %42 = vector.broadcast %c15_i32_8 : i32 to vector<4x128xi32>
    %43 = arith.shrui %41, %42 : vector<4x128xi32>
    %44 = arith.xori %41, %43 : vector<4x128xi32>
    %c-2073254261_i32_9 = arith.constant -2073254261 : i32
    %45 = vector.broadcast %c-2073254261_i32_9 : i32 to vector<4x128xi32>
    %46 = arith.muli %44, %45 : vector<4x128xi32>
    %c16_i32_10 = arith.constant 16 : i32
    %47 = vector.broadcast %c16_i32_10 : i32 to vector<4x128xi32>
    %48 = arith.shrui %46, %47 : vector<4x128xi32>
    %49 = arith.xori %46, %48 : vector<4x128xi32>
    %c9_i32 = arith.constant 9 : i32
    %50 = vector.broadcast %c9_i32 : i32 to vector<4x128xi32>
    %51 = arith.shrui %32, %50 : vector<4x128xi32>
    %c1065353216_i32 = arith.constant 1065353216 : i32
    %52 = vector.broadcast %c1065353216_i32 : i32 to vector<4x128xi32>
    %53 = arith.ori %52, %51 : vector<4x128xi32>
    %54 = tpu.bitcast %53 : vector<4x128xi32> -> vector<4x128xf32>
    %cst = arith.constant 2.000000e+00 : f32
    %55 = vector.broadcast %cst : f32 to vector<4x128xf32>
    %56 = arith.subf %55, %54 : vector<4x128xf32>
    %c9_i32_11 = arith.constant 9 : i32
    %57 = vector.broadcast %c9_i32_11 : i32 to vector<4x128xi32>
    %58 = arith.shrui %49, %57 : vector<4x128xi32>
    %c1065353216_i32_12 = arith.constant 1065353216 : i32
    %59 = vector.broadcast %c1065353216_i32_12 : i32 to vector<4x128xi32>
    %60 = arith.ori %59, %58 : vector<4x128xi32>
    %61 = tpu.bitcast %60 : vector<4x128xi32> -> vector<4x128xf32>
    %cst_13 = arith.constant 1.000000e+00 : f32
    %62 = vector.broadcast %cst_13 : f32 to vector<4x128xf32>
    %63 = arith.subf %61, %62 : vector<4x128xf32>
    %64 = math.log %56 : vector<4x128xf32>
    %cst_14 = arith.constant -2.000000e+00 : f32
    %65 = vector.broadcast %cst_14 : f32 to vector<4x128xf32>
    %66 = arith.mulf %65, %64 : vector<4x128xf32>
    %67 = math.sqrt %66 : vector<4x128xf32>
    %cst_15 = arith.constant 6.28318548 : f32
    %68 = vector.broadcast %cst_15 : f32 to vector<4x128xf32>
    %69 = arith.mulf %68, %63 : vector<4x128xf32>
    %70 = math.cos %69 : vector<4x128xf32>
    %71 = arith.mulf %67, %70 : vector<4x128xf32>
    %c0_16 = arith.constant 0 : index
    %c0_17 = arith.constant 0 : index
    %72 = vector.load %arg2[%c0_16, %c0_17] : memref<8x128xf32, #tpu.memory_space<vmem>>, vector<4x128xf32>
    tpu.vector_store %arg2[%c0_16, %c0_17], %71 {strides = array<i32>} : memref<8x128xf32, #tpu.memory_space<vmem>>, vector<4x128xf32>,
    %73 = math.sin %69 : vector<4x128xf32>
    %74 = arith.mulf %67, %73 : vector<4x128xf32>
    %c4 = arith.constant 4 : index
    %c0_18 = arith.constant 0 : index
    %75 = vector.load %arg2[%c4, %c0_18] : memref<8x128xf32, #tpu.memory_space<vmem>>, vector<4x128xf32>
    tpu.vector_store %arg2[%c4, %c0_18], %74 {strides = array<i32>} : memref<8x128xf32, #tpu.memory_space<vmem>>, vector<4x128xf32>,
    return
  }
  func.func @transform_0(%arg0: i32) -> i32 {
    %c0_i32 = arith.constant 0 : i32
    %c0_i32_0 = arith.constant 0 : i32
    return %c0_i32 : i32
  }
  func.func @transform_1(%arg0: i32) -> (i32, i32) {
    %c0_i32 = arith.constant 0 : i32
    %c0_i32_0 = arith.constant 0 : i32
    return %arg0, %c0_i32 : i32, i32
  }
}

</mosaic_0001>

<bundles_post_ra>
// kernel: tpu_custom_call.1
= control target key start
LH: loop header
LB: loop body
LE: loop exit
PB: predicated region body
PF: predicated region fallthrough
CT: control target
= control target key end

     0   :  { %s823_s0 = inlined_call_operand.<no memory space> [shape: s32[1], index: 0, kind: input, shape index: {}]   ;;  %s824_s1 = inlined_call_operand.hbm [shape: f32[16,128], index: 1, kind: output, shape index: {}]  }
   0x1   :  { %6 = sst [smem:[#allocation2]] %s823_s0 }
   0x2   :  { %7 = vsyncpa [#allocation4], 0 }
   0x3   :  { %9 = vsyncpa [#allocation4 + $0x1], 0  ;;  %s684_s8 = smov 0   ;;  %s686_s9 = smov 0  }
   0x4   :  { %s688_s10 = smov 0   ;;  %s690_s11 = smov 0  }
   0x5 LB: > { %s533_s0 = sadd.s32 4294967295, %s662_s11   ;;  %s534_s12 = sadd.s32 4294967294, %s662_s11   ;;  %s662_s11 = sphi %s690_s11, %s830_s11   ;;  %s658_s10 = sphi %s688_s10, %s829_s10   ;;  %s654_s9 = sphi %s686_s9, %s828_s9   ;;  %s650_s8 = sphi %s684_s8, %s827_s8  }
   0x6   : > { %s707_s13 = sadd.s32 1, %s662_s11   ;;  %s43_s14 = sadd.s32 1, %s658_s10 }
   0x7   : > { %s40_s15 = ssub.s32 %s662_s11, %s707_s13  ;;  %p53_p0 = scmp.ne.s32.totalorder %s658_s10, %s654_s9 }
   0x8   : > { %p41_p1 = scmp.eq.s32.totalorder %s40_s15, 0  ;;  %p54_p2 = scmp.eq.s32.totalorder %s533_s0, 1 }
   0x9   : > { %p59_p3 = scmp.ne.s32.totalorder %s654_s9, %s650_s8  ;;  %p60_p4 = scmp.eq.s32.totalorder %s534_s12, 1 }
   0xa   : > { %s717_s16 = scalar_select %p41_p1, %s658_s10, %s43_s14  }
   0xb   : > { %p719_p5 = por %p54_p2, %p53_p0  ;;  %p723_p6 = por %p60_p4, %p59_p3 }
   0xc   : > { %p536_p7 = scmp.ge.s32.totalorder %s662_s11, 1  ;;  %p81_p8 = scmp.lt.s32.totalorder %s662_s11, 3 }
   0xe   : > { %p82_p9 = pnand %p536_p7, %p81_p8 }
   0xf   : > { %s729_s19 = sshll.u32 (!%p82_p9), %s533_s0, 3  ;;  %s105_s20 = sld [smem:[#allocation2]] (!%p82_p9) }
  0x10   : > { %85 = sbr.rel (%p82_p9) target bundleno = 163 (0xa3), region = 24  ;;  %s93_s30 = sand.u32 (!%p82_p9), 1, %s654_s9  }
  0x11   : > { %s537_s2 = sshll.u32 (!%p82_p9), %s93_s30, 3  ;;  %s482_s5 = scalar_lea.hbm (!%p82_p9), %s824_s1, %s729_s19 }
  0x12   : > { %s95_s6 = scalar_lea.vmem (!%p82_p9), [#allocation3], %s537_s2  ;;  %s486_s0 = sshll.u32 (!%p82_p9), %s482_s5, 4  ;;  %s487_s0 = int_to_ptr.hbm [resolvable:$true] %s486_s0 }
  0x13   : > { %s484_s7 = sshll.u32 (!%p82_p9), %s95_s6, 4  ;;  %s472_s12 = scalar_lea.sflag (!%p82_p9), [#allocation4], %s93_s30  ;;  %s485_s7 = int_to_ptr.vmem [resolvable:$true] %s484_s7 }
  0x14   : > { %s614_s14 = sshra.s32 (!%p82_p9), %s487_s0, 4  ;;  %s615_s14 = int_to_ptr.hbm [resolvable:$true] %s614_s14 }
  0x15   : > { %v96_v0 = vlaneseq  ;;  %v101_v2 = vstv %s729_s19  ;;  %s106_s21 = sxor.u32 2769414579, %s105_s20  ;;  %v664_v38 = vmov 683565275   ;;  %v665_v40 = vmov 2475754826   ;;  %p621_p13 = scmp.lt.s32.totalorder %s615_s14, %s824_s1 }
  0x16   : > { %s107_s22 = sshrl.u32 %s106_s21, 16  ;;  %v666_v42 = vmov 2131351028   ;;  %v667_v44 = vmov 2102212464   ;;  %s616_s15 = scalar_lea.hbm %s615_s14, 8 }
  0x17   : > { %v97_v1 = vshrl.u32 %v96_v0, 7  ;;  %s108_s23 = sxor.u32 %s107_s22, %s106_s21  ;;  %v99_v4 = vand.u32 127, %v96_v0  ;;  %v668_v46 = vmov 920167782   ;;  %v669_v53 = vmov 1326507024   ;;  %p617_p10 = scmp.ne.s32.totalorder %s615_s14, %s616_s15 }
  0x18   : > { %s109_s24 = smul.u32 2146121005, %s108_s23  ;;  %s620_s21 = scalar_lea.hbm %s824_s1, 16 }
  0x19   : > { %v102_v3 = vadd.s32 %v101_v2, %v97_v1  ;;  %p618_p11 = pnand %p617_p10, %p719_p5  ;;  %p622_p0 = scmp.lt.s32.totalorder %s620_s21, %s616_s15 }
  0x1a   : > { %s110_s25 = sshrl.u32 %s109_s24, 15 }
  0x1b   : > { %v103_v5 = vshll.u32 %v102_v3, 7  ;;  %s111_s26 = sxor.u32 %s110_s25, %s109_s24  ;;  %p619_p12 = pneg %p618_p11 }
  0x1c   : > { %s112_s27 = smul.u32 2221713035, %s111_s26  ;;  %p623_p1 = por %p622_p0, %p621_p13 }
  0x1d   : > { %v104_v6 = vadd.s32 %v103_v5, %v99_v4 }
  0x1e   : > { %s113_s28 = sshrl.u32 %s112_s27, 16  ;;  %p624_p2 = pnand %p623_p1, %p619_p12 }
  0x1f   : > { %s114_s29 = sxor.u32 %s113_s28, %s112_s27 }
  0x20   : > { %v115_v7 = vstv %s114_s29 }
  0x21   : > { %v116_v8 = vxor.u32 %v115_v7, %v104_v6 }
  0x23   : > { %v125_v9 = vadd.s32 2654435769, %v116_v8  ;;  %v117_v19 = vshrl.u32 %v116_v8, 16 }
  0x25   : > { %v126_v10 = vshrl.u32 %v125_v9, 16  ;;  %v118_v22 = vxor.u32 %v117_v19, %v116_v8 }
  0x27   : > { %v127_v11 = vxor.u32 %v126_v10, %v125_v9  ;;  %v119_v25 = vmul.u32 2146121005, %v118_v22 }
  0x29   : > { %v128_v12 = vmul.u32 2146121005, %v127_v11  ;;  %v120_v29 = vshrl.u32 %v119_v25, 15 }
  0x2b   : > { %v129_v13 = vshrl.u32 %v128_v12, 15  ;;  %v121_v33 = vxor.u32 %v120_v29, %v119_v25 }
  0x2d   : > { %v130_v14 = vxor.u32 %v129_v13, %v128_v12  ;;  %v122_v48 = vmul.u32 2221713035, %v121_v33 }
  0x2f   : > { %v131_v15 = vmul.u32 2221713035, %v130_v14  ;;  %v123_v62 = vshrl.u32 %v122_v48, 16 }
  0x31   : > { %v132_v16 = vshrl.u32 %v131_v15, 16  ;;  %v124_v11 = vxor.u32 %v123_v62, %v122_v48 }
  0x33   : > { %v133_v17 = vxor.u32 %v132_v16, %v131_v15 }
  0x35   : > { %v138_v18 = vshrl.u32 %v133_v17, 9 }
  0x37   : > { %v139_v20 = vor.u32 1065353216, %v138_v18 }
  0x39   : > { %v539_v21 = vadd.f32 -1.0, %v139_v20 }
  0x3b   : > { %v732_v23 = vmul.f32 6.2831855, %v539_v21 }
  0x3d   : > { %v161_v24 = vand.u32 2139095040, %v732_v23  ;;  %v158_v27 = vand.u32 2147483647, %v732_v23  ;;  %vm160_vm12 = vcmp.lt.s32.totalorder %v732_v23, 0 }
  0x3f   : > { %v162_v26 = vshrl.u32 %v161_v24, 23  ;;  %v165_v31 = vand.u32 8388607, %v158_v27  ;;  %v134_v24 = vshrl.u32 %v124_v11, 9  ;;  %vm159_vm13 = vcmp.le.f32.partialorder %v158_v27, 0.7853982 }
  0x41   : > { %v540_v28 = vadd.s32 4294967169, %v162_v26  ;;  %v166_v36 = vor.u32 8388608, %v165_v31  ;;  %v135_v48 = vor.u32 1065353216, %v134_v24 }
  0x43   : > { %v168_v30 = vadd.s32 1, %v540_v28  ;;  %v742_v57 = vshll.u32 %v166_v36, 8 }
  0x45   : > { %vm169_vm0 = vcmp.gt.s32.totalorder %v168_v30, 0  ;;  %v207_v4 = vand.u32 65535, %v742_v57  ;;  %v208_v5 = vshrl.u32 %v742_v57, 16 }
  0x46   : > { %v170_v32 = vsel %vm169_vm0, %v168_v30, 0 }
  0x47   : > { %v172_v34 = vand.u32 31, %v170_v32  ;;  %v738_v35 = vshrl.u32 %v170_v32, 5  ;;  %v670_v32 = vmov 0  }
  0x49   : > { %v173_v37 = vsub.s32 32, %v172_v34  ;;  %v175_v39 = vshll.u32 %v664_v38, %v172_v34  ;;  %v178_v41 = vshll.u32 %v665_v40, %v172_v34  ;;  %v181_v43 = vshll.u32 %v666_v42, %v172_v34 }
  0x4a   : > { %v184_v45 = vshll.u32 %v667_v44, %v172_v34  ;;  %v187_v47 = vshll.u32 %v668_v46, %v172_v34  ;;  %vm190_vm1 = vcmp.lt.s32.totalorder %v738_v35, 1  ;;  %vm193_vm2 = vcmp.lt.s32.totalorder %v738_v35, 4 }
  0x4b   : > { %v176_v49 = vshrl.u32 %v665_v40, %v173_v37  ;;  %v179_v50 = vshrl.u32 %v666_v42, %v173_v37  ;;  %v182_v51 = vshrl.u32 %v667_v44, %v173_v37  ;;  %v185_v52 = vshrl.u32 %v668_v46, %v173_v37 }
  0x4c   : > { %v188_v54 = vshrl.u32 %v669_v53, %v173_v37  ;;  %vm192_vm3 = vcmp.lt.s32.totalorder %v738_v35, 3  ;;  %vm191_vm4 = vcmp.lt.s32.totalorder %v738_v35, 2  ;;  %v174_v13 = vshrl.u32 %v664_v38, %v173_v37 }
  0x4d   : > { %v177_v55 = vor.u32 %v176_v49, %v175_v39  ;;  %v180_v56 = vor.u32 %v179_v50, %v178_v41  ;;  %v183_v58 = vor.u32 %v182_v51, %v181_v43  ;;  %v186_v59 = vor.u32 %v185_v52, %v184_v45 }
  0x4e   : > { %v189_v60 = vor.u32 %v188_v54, %v187_v47 }
  0x4f   : > { %v198_v61 = vsel %vm190_vm1, %v177_v55, %v180_v56  ;;  %v199_v63 = vsel %vm193_vm2, %v186_v59, 920167782  ;;  %v202_v0 = vsel %vm190_vm1, %v180_v56, %v183_v58  ;;  %v194_v28 = vsel %vm190_vm1, %v174_v13, %v177_v55 }
  0x50   : > { %v203_v1 = vsel %vm193_vm2, %v189_v60, 1326507024  ;;  %v200_v2 = vsel %vm192_vm3, %v183_v58, %v199_v63  ;;  %v195_v31 = vsel %vm193_vm2, %v183_v58, 2102212464  ;;  %v137_v55 = vsub.f32 2.0, %v135_v48 }
  0x51   : > { %v204_v3 = vsel %vm192_vm3, %v186_v59, %v203_v1  ;;  %v201_v6 = vsel %vm191_vm4, %v198_v61, %v200_v2  ;;  %v196_v42 = vsel %vm192_vm3, %v180_v56, %v195_v31 }
  0x52   : > { %v205_v7 = vsel %vm191_vm4, %v202_v0, %v204_v3  ;;  %v231_v10 = vand.u32 65535, %v201_v6  ;;  %v232_v12 = vshrl.u32 %v201_v6, 16  ;;  %v197_v51 = vsel %vm191_vm4, %v194_v28, %v196_v42 }
  0x53   : > { %v209_v8 = vand.u32 65535, %v205_v7  ;;  %v210_v9 = vshrl.u32 %v205_v7, 16  ;;  %v251_v58 = vmul.u32 %v742_v57, %v197_v51  ;;  %596 = vlog2.f32 %v137_v55 }
  0x54   : > { %v233_v17 = vmul.u32 %v231_v10, %v207_v4  ;;  %v234_v18 = vmul.u32 %v232_v12, %v207_v4  ;;  %v235_v19 = vmul.u32 %v231_v10, %v208_v5  ;;  %v236_v25 = vmul.u32 %v232_v12, %v208_v5 }
  0x55   : > { %v211_v14 = vmul.u32 %v209_v8, %v207_v4  ;;  %v212_v15 = vmul.u32 %v210_v9, %v207_v4  ;;  %v213_v16 = vmul.u32 %v209_v8, %v208_v5  ;;  %v214_v20 = vmul.u32 %v210_v9, %v208_v5 }
  0x56   : > { %v237_v26 = vshll.u32 %v234_v18, 16  ;;  %v239_v30 = vshll.u32 %v235_v19, 16  ;;  %v238_v40 = vshrl.u32 %v234_v18, 16  ;;  %v240_v46 = vshrl.u32 %v235_v19, 16 }
  0x57   : > { %v215_v21 = vshll.u32 %v212_v15, 16  ;;  %v217_v22 = vshll.u32 %v213_v16, 16  ;;  %v216_v36 = vshrl.u32 %v212_v15, 16  ;;  %v218_v43 = vshrl.u32 %v213_v16, 16 }
  0x58   : > { %vm241_vm6 = vc.u32 %v233_v17, %v237_v26  ;;  %v243_v34 = vadd.s32 %v237_v26, %v233_v17 }
  0x59   : > { %vm219_vm5 = vc.u32 %v211_v14, %v215_v21  ;;  %v221_v29 = vadd.s32 %v215_v21, %v211_v14  ;;  %v242_v38 = vsel %vm241_vm6, 1, %v670_v32  ;;  %v597_v63 = vpop.eup %596  ;;  %vm301_vm6 = vweird.f32 %v732_v23 }
  0x5a   : > { %v220_v33 = vsel %vm219_vm5, 1, %v670_v32  ;;  %v244_v41 = vadd.s32 %v242_v38, %v236_v25  ;;  %vm245_vm8 = vc.u32 %v243_v34, %v239_v30  ;;  %v247_v50 = vadd.s32 %v243_v34, %v239_v30 }
  0x5b   : > { %v222_v37 = vadd.s32 %v220_v33, %v214_v20  ;;  %vm223_vm7 = vc.u32 %v221_v29, %v217_v22  ;;  %v246_v45 = vsel %vm245_vm8, 1, %v670_v32  ;;  %v143_v2 = vmul.f32 0.6931472, %v597_v63 }
  0x5c   : > { %v224_v39 = vsel %vm223_vm7, 1, %v670_v32  ;;  %v248_v47 = vadd.s32 %v246_v45, %v244_v41 }
  0x5d   : > { %v226_v44 = vadd.s32 %v224_v39, %v222_v37  ;;  %v773_v4 = vmul.f32 -2.0, %v143_v2 }
  0x5e   : > { %v249_v52 = vadd.s32 %v248_v47, %v238_v40 }
  0x5f   : > { %v227_v49 = vadd.s32 %v226_v44, %v216_v36  ;;  %598 = vrsqrt.f32 %v773_v4  ;;  %vm152_vm14 = vcmp.eq.f32.partialorder %v773_v4, inf  ;;  %vm154_vm1 = vcmp.eq.f32.partialorder %v773_v4, 0.0 }
  0x60   : > { %v250_v54 = vadd.s32 %v249_v52, %v240_v46 }
  0x61   : > { %v228_v53 = vadd.s32 %v227_v49, %v218_v43 }
  0x62   : > { %v254_v59 = vadd.s32 1, %v250_v54 }
  0x63   : > { %vm253_vm9 = vc.u32 %v228_v53, %v247_v50  ;;  %v252_v57 = vadd.s32 %v247_v50, %v228_v53  ;;  %v155_v50 = vand.u32 2147483648, %v773_v4 }
  0x64   : > { %v255_v56 = vsel %vm253_vm9, %v254_v59, %v250_v54 }
  0x65   : > { %v256_v60 = vadd.s32 %v255_v56, %v251_v58  ;;  %v599_v13 = vpop.eup %598 }
  0x66   : > { %v146_v18 = vmul.f32 %v599_v13, %v773_v4 }
  0x67   : > { %v257_v61 = vadd.s32 536870912, %v256_v60 }
  0x68   : > { %v147_v21 = vmul.f32 %v599_v13, %v146_v18 }
  0x69   : > { %v258_v62 = vshrl.u32 %v257_v61, 30 }
  0x6a   : > { %v148_v26 = vmul.f32 0.5, %v147_v21 }
  0x6b   : > { %v259_v0 = vshll.u32 %v258_v62, 30  ;;  %v282_v22 = vsub.s32 4, %v258_v62 }
  0x6c   : > { %v149_v34 = vsub.f32 1.5, %v148_v26 }
  0x6d   : > { %v260_v1 = vsub.s32 %v256_v60, %v259_v0  ;;  %v283_v28 = vsel %vm160_vm12, %v282_v22, %v258_v62 }
  0x6e   : > { %v285_v31 = vsel %vm159_vm13, 0, %v283_v28  ;;  %v150_v41 = vmul.f32 %v599_v13, %v149_v34 }
  0x6f   : > { %vm261_vm10 = vcmp.lt.s32.totalorder %v260_v1, 0  ;;  %v262_v35 = vsub.s32 0, %v260_v1  ;;  %v458_v38 = vadd.s32 3, %v285_v31  ;;  %v302_v43 = vand.u32 3, %v285_v31 }
  0x70   : > { %v151_v47 = vmul.f32 %v150_v41, %v773_v4 }
  0x71   : > { %v263_v3 = vsel %vm261_vm10, %v262_v35, %v260_v1  ;;  %v459_v44 = vand.u32 3, %v458_v38  ;;  %vm307_vm15 = vcmp.eq.s32.totalorder %v302_v43, 2  ;;  %vm303_vm2 = vcmp.lt.s32.totalorder %v302_v43, 2 }
  0x72   : > { %v264_v5 = vclz %v263_v3  ;;  %v153_v53 = vsel %vm152_vm14, %v773_v4, %v151_v47  ;;  %vm304_vm3 = vcmp.eq.s32.totalorder %v302_v43, 0 }
  0x73   : > { %vm464_vm0 = vcmp.eq.s32.totalorder %v459_v44, 2  ;;  %vm461_vm4 = vcmp.eq.s32.totalorder %v459_v44, 0  ;;  %vm460_vm5 = vcmp.lt.s32.totalorder %v459_v44, 2  ;;  %v156_v59 = vsel %vm154_vm1, %v155_v50, %v153_v53 }
  0x74   : > { %v541_v6 = vadd.s32 4294967294, %v264_v5 }
  0x76   : > { %vm542_vm11 = vcmp.lt.s32.totalorder %v541_v6, 0 }
  0x77   : > { %v267_v7 = vsel %vm542_vm11, 0, %v541_v6 }
  0x78   : > { %v268_v8 = vsub.s32 32, %v267_v7  ;;  %v269_v9 = vshll.u32 %v260_v1, %v267_v7  ;;  %v272_v10 = vsub.s32 4294967266, %v267_v7 }
  0x7a   : > { %v270_v11 = vshrl.u32 %v252_v57, %v268_v8  ;;  %v273_v12 = vadd.s32 127, %v272_v10 }
  0x7c   : > { %v271_v14 = vor.u32 %v270_v11, %v269_v9  ;;  %v274_v15 = vshll.u32 %v273_v12, 23 }
  0x7e   : > { %v275_v16 = vor.u32 4788187, %v274_v15  ;;  %v278_v17 = vcvt.s32.f32 %v271_v14 }
  0x80   : > { %v276_v19 = vand.u32 2147483647, %v275_v16 }
  0x82   : > { %v279_v20 = vmul.f32 %v278_v17, %v276_v19 }
  0x84   : > { %v280_v24 = vxor.u32 2147483648, %v279_v20 }
  0x86   : > { %v281_v25 = vsel %vm160_vm12, %v280_v24, %v279_v20 }
  0x87   : > { %v284_v29 = vsel %vm159_vm13, %v732_v23, %v281_v25 }
  0x88   : > { %v286_v30 = vmul.f32 %v284_v29, %v284_v29 }
  0x8a   : > { %v287_v32 = vmul.f32 -0.001358992, %v286_v30  ;;  %v294_v33 = vmul.f32 -0.00019511016, %v286_v30 }
  0x8c   : > { %v288_v36 = vadd.f32 0.041655596, %v287_v32  ;;  %v295_v37 = vadd.f32 0.008332121, %v294_v33 }
  0x8e   : > { %v289_v39 = vmul.f32 %v288_v36, %v286_v30  ;;  %v296_v40 = vmul.f32 %v295_v37, %v286_v30 }
  0x90   : > { %v290_v27 = vadd.f32 -0.4999988, %v289_v39  ;;  %v297_v42 = vadd.f32 -0.16666654, %v296_v40 }
  0x92   : > { %v291_v45 = vmul.f32 %v290_v27, %v286_v30  ;;  %v298_v46 = vmul.f32 %v297_v42, %v286_v30 }
  0x94   : > { %v292_v48 = vadd.f32 1.0, %v291_v45  ;;  %v299_v49 = vadd.f32 1.0, %v298_v46 }
  0x96   : > { %v300_v51 = vmul.f32 %v299_v49, %v284_v29  ;;  %v308_v52 = vxor.u32 2147483648, %v292_v48 }
  0x98   : > { %v305_v54 = vxor.u32 2147483648, %v300_v51  ;;  %v309_v55 = vsel %vm307_vm15, %v308_v52, %v300_v51  ;;  %v466_v58 = vsel %vm464_vm0, %v308_v52, %v300_v51 }
  0x9a   : > { %v306_v56 = vsel %vm304_vm3, %v292_v48, %v305_v54  ;;  %v463_v60 = vsel %vm461_vm4, %v292_v48, %v305_v54 }
  0x9b   : > { %v310_v61 = vsel %vm303_vm2, %v306_v56, %v309_v55  ;;  %v467_v62 = vsel %vm460_vm5, %v463_v60, %v466_v58 }
  0x9c   : > { %v311_v63 = vsel %vm301_vm6, nan, %v310_v61  ;;  %v468_v0 = vsel %vm301_vm6, nan, %v467_v62 }
  0x9d   : > { %v312_v1 = vmul.f32 %v311_v63, %v156_v59  ;;  %v469_v2 = vmul.f32 %v468_v0, %v156_v59 }
  0x9f   : > { %313 = vst [vmem:[%s95_s6] sm:$0xf] %v312_v1 }
  0xa0   : > { %470 = vst [vmem:[%s95_s6 + $0x4] sm:$0xf] %v469_v2 }
  0xa1   : > { %627 = shalt.err (!%p624_p2)
}
  0xa2   : > { %550 = dma.vmem_to_hbm [thread:$0]  (%p719_p5), %s485_s7, 128, %s487_s0, %s472_s12  }
  0xa3 PF: > { %p556_p3 = scmp.ge.s32.totalorder %s662_s11, 2  ;;  %s498_s24 = sand.u32 1, %s650_s8  }
  0xa4   : > { %s499_s25 = scalar_lea.sflag [#allocation4], %s498_s24 }
  0xa5   : > { %p553_p4 = pnand %p556_p3, %p723_p6 }
  0xa7   : > { %p554_p7 = pneg %p553_p4 }
  0xa9   : > { %645 = dma.done.wait (%p554_p7), %s499_s25, 128  }
  0xaa   : > { %647 = vsyncadd (%p554_p7), %s499_s25, 4294967168  ;;  %p12_p8 = scmp.ge.s32.totalorder %s707_s13, 4   ;;  %s827_s8 = smov %s654_s9 }
  0xab   : > { %s828_s9 = smov %s658_s10  ;;  %s829_s10 = smov %s717_s16 }
  0xac   : > { %s830_s11 = smov %s707_s13  ;;  %14 = sbr.rel (!%p12_p8) target bundleno = 5 (0x5), region = 56 }
  0xb1   :  { %505 = vsyncpa [#allocation4], 1 }
  0xb2   :  { %507 = vsyncpa [#allocation4 + $0x1], 1 }

</bundles_post_ra>
